<compile_context>
chip_gen: v6e
topology: v6e:2x2x1
jax: 0.10.0
libtpu: 0.0.40
codegen_flags: <defaults>
</compile_context>

<pallas_src>
import jax
import jax.numpy as jnp
from jax.experimental import pallas as pl
from jax.experimental.pallas import tpu as pltpu

# ---- problem sizes (small, consistent with the module's forward) ----
B = 2      # batch (variants)
L = 8      # sequence length
E = 16     # token-embedding dim
H = 32     # hidden size of last_hidden_state
V = 6      # vocab size (DNA-ish tokens)
VP = 8     # vocab padded to a lane-friendly 8
NG = 2 * B           # (strand, batch) groups per ref/alt side: fwd_b0, fwd_b1, rev_b0, rev_b1
K_OH = NG * VP       # 32  : one-hot width / matmul contraction dim
W_HID = NG * H       # 128 : packed hidden lane width (one full f32 vreg row)

PAIR_EPS = 1e-6   # F.pairwise_distance eps (added to the difference)
COS_EPS = 1e-8    # F.cosine_similarity eps (clamps product of sq-norms at eps^2)

OUT_W = 3 + 3 * H      # 99 real output columns
PAD_W = 128            # lane-dense padded output width
PAD_ROWS = 8           # sublane-dense padded output rows (one unmasked (8,128) store)


def _group_sums(x):
    """(R, NG*H) -> (R, NG): exact f32 sums over each 32-lane group."""
    return jnp.concatenate(
        [jnp.sum(x[:, g * H:(g + 1) * H], axis=1, keepdims=True) for g in range(NG)],
        axis=1)


def _vep_kernel(oh_r_ref, oh_a_ref, tbl_ref, out_ref):
    # Gather-via-matmul: one-hot (L, NG*VP) @ block-diag table (NG*VP, NG*H)
    # materializes the hidden states directly in the packed
    # (L = 8 sublanes, NG*H = 128 lanes) layout -> single-vreg VPU work below.
    hr = jnp.dot(oh_r_ref[...], tbl_ref[...],
                 preferred_element_type=jnp.float32,
                 precision=jax.lax.Precision.HIGHEST)            # (L, 128) ref hidden
    ha = jnp.dot(oh_a_ref[...], tbl_ref[...],
                 preferred_element_type=jnp.float32,
                 precision=jax.lax.Precision.HIGHEST)            # (L, 128) alt hidden

    prod = hr * ha
    diff = hr - ha

    # Cross-sublane reductions over L -> (1, 128) per-(group, hidden-unit) partials.
    ips_h = jnp.sum(prod, axis=0, keepdims=True)         # inner_products
    nr2_h = jnp.sum(hr * hr, axis=0, keepdims=True)
    na2_h = jnp.sum(ha * ha, axis=0, keepdims=True)
    d2_h = jnp.sum(diff * diff, axis=0, keepdims=True)   # ||r - a||^2 over L
    sd_h = jnp.sum(diff, axis=0, keepdims=True)          # sum(r - a) over L (eps term)

    # --- per hidden-unit scores (still packed along the 128 lanes) ---
    eucls = jnp.sqrt(d2_h)
    cosds = 1.0 - ips_h * jax.lax.rsqrt(
        jnp.maximum(nr2_h * na2_h, COS_EPS * COS_EPS))

    # --- flattened (L*H) scalar scores, built from the H partials ---
    psums = _group_sums(
        jnp.concatenate([ips_h, nr2_h, na2_h, d2_h, sd_h], axis=0))   # (5, NG)
    ip_g, nr2_g, na2_g, d2_g, sd_g = (psums[i:i + 1, :] for i in range(5))
    # sum((diff + eps)^2) = sum diff^2 + 2*eps*sum diff + L*H*eps^2  (algebraic)
    pe_g = d2_g + (2.0 * PAIR_EPS) * sd_g + (L * H) * (PAIR_EPS * PAIR_EPS)
    eucl_g = jnp.sqrt(pe_g)
    cosd_g = 1.0 - ip_g * jax.lax.rsqrt(
        jnp.maximum(nr2_g * na2_g, COS_EPS * COS_EPS))

    # --- average fwd / rev strands (groups ordered [fwd_b0, fwd_b1, rev_b0, rev_b1]) ---
    eucls_b = 0.5 * (eucls[:, :B * H] + eucls[:, B * H:])   # (1, B*H)
    ips_b = 0.5 * (ips_h[:, :B * H] + ips_h[:, B * H:])
    cosds_b = 0.5 * (cosds[:, :B * H] + cosds[:, B * H:])
    eucl_b = 0.5 * (eucl_g[:, :B] + eucl_g[:, B:])          # (1, B)
    ip_b = 0.5 * (ip_g[:, :B] + ip_g[:, B:])
    cosd_b = 0.5 * (cosd_g[:, :B] + cosd_g[:, B:])

    # --- assemble 32-lane-aligned rows and do ONE unmasked (8, 128) store ---
    # column layout: [eucls(32) | ips(32) | cosds(32) | eucl | ip | cosd | pad(29)]
    rows = []
    for b in range(B):
        rows.append(jnp.concatenate(
            [eucls_b[:, b * H:(b + 1) * H],
             ips_b[:, b * H:(b + 1) * H],
             cosds_b[:, b * H:(b + 1) * H],
             eucl_b[:, b:b + 1], ip_b[:, b:b + 1], cosd_b[:, b:b + 1],
             jnp.zeros((1, PAD_W - OUT_W), jnp.float32)], axis=1))
    rows.append(jnp.zeros((PAD_ROWS - B, PAD_W), jnp.float32))
    out_ref[...] = jnp.concatenate(rows, axis=0)


def vep_init(embed_table, w_proj, b_proj):
    """One-time (per-model) fold of the synthetic backbone into a block-diag table.

    hidden(ids) = (embed @ W + b)[ids] is row-linear, so the (V, H) table is
    exact; it is replicated on the diagonal of a (NG*VP, NG*H) matrix so a
    single one-hot matmul gathers all NG (strand, batch) streams at once,
    already in the kernel's packed lane layout.
    """
    table_h = (jnp.dot(embed_table.astype(jnp.float32),
                       w_proj.astype(jnp.float32),
                       precision=jax.lax.Precision.HIGHEST)
               + b_proj.astype(jnp.float32))                      # (V, H)
    tbl_p = jnp.zeros((VP, H), jnp.float32).at[:V].set(table_h)   # pad V 6 -> 8
    return jnp.kron(jnp.eye(NG, dtype=jnp.float32), tbl_p)        # (NG*VP, NG*H) = (32, 128)


def _one_hot_streams(ids_fwd, ids_rev):
    """(B, L) fwd/rev int ids -> (L, NG*VP) f32 one-hot; lane = (strand*B + b)*VP + v."""
    ids = jnp.concatenate([ids_fwd, ids_rev], axis=0).astype(jnp.int32)        # (NG, L)
    oh = (ids[:, :, None] == jnp.arange(VP, dtype=jnp.int32)).astype(jnp.float32)
    return jnp.transpose(oh, (1, 0, 2)).reshape(L, K_OH)                       # (L, 32)


@jax.jit
def vep_forward(ids_ref_fwd, ids_alt_fwd, ids_ref_rev, ids_alt_rev, blk_tbl):
    """Forward of ModelforVEPModel with the synthetic (folded) backbone."""
    oh_r = _one_hot_streams(ids_ref_fwd, ids_ref_rev)   # (L, 32)
    oh_a = _one_hot_streams(ids_alt_fwd, ids_alt_rev)   # (L, 32)

    out_padded = pl.pallas_call(
        _vep_kernel,
        out_shape=jax.ShapeDtypeStruct((PAD_ROWS, PAD_W), jnp.float32),
        grid=(1,),
        in_specs=[pl.BlockSpec((L, K_OH), lambda i: (0, 0)),
                  pl.BlockSpec((L, K_OH), lambda i: (0, 0)),
                  pl.BlockSpec((K_OH, W_HID), lambda i: (0, 0))],
        out_specs=pl.BlockSpec((PAD_ROWS, PAD_W), lambda i: (0, 0)),
        compiler_params=pltpu.CompilerParams(
            dimension_semantics=("arbitrary",)),
    )(oh_r, oh_a, blk_tbl)

    out = out_padded[:B]
    # kernel packs [eucls | ips | cosds | eucl ip cosd | pad]; restore the
    # module's column order [eucl, ip, cosd, eucls, ips, cosds].
    return jnp.concatenate([out[:, 3 * H:3 * H + 3], out[:, :3 * H]], axis=1)  # (B, 99)


def _reference(ids_ref_fwd, ids_alt_fwd, ids_ref_rev, ids_alt_rev,
               embed_table, w_proj, b_proj):
    """Pure-JAX reference mirroring the PyTorch semantics."""
    def hidden(ids):
        x = jnp.take(embed_table, ids, axis=0).astype(jnp.float32)
        return jnp.einsum("ble,eh->blh", x, w_proj,
                          precision=jax.lax.Precision.HIGHEST) + b_proj[0]

    def scores(hr, ha):
        Bc = hr.shape[0]
        fr, fa = hr.reshape(Bc, -1), ha.reshape(Bc, -1)
        eucl = jnp.sqrt(jnp.sum((fr - fa + PAIR_EPS) ** 2, axis=1))
        ip = jnp.sum(fr * fa, axis=1)
        cosd = 1.0 - ip / jnp.sqrt(
            jnp.maximum(jnp.sum(fr * fr, axis=1) * jnp.sum(fa * fa, axis=1),
                        COS_EPS * COS_EPS))
        eucls = jnp.linalg.norm(hr - ha, axis=1)
        ips = jnp.sum(hr * ha, axis=1)
        cosds = 1.0 - ips / jnp.sqrt(
            jnp.maximum(jnp.sum(hr * hr, axis=1) * jnp.sum(ha * ha, axis=1),
                        COS_EPS * COS_EPS))
        return jnp.concatenate([eucl[:, None], ip[:, None], cosd[:, None],
                                eucls, ips, cosds], axis=1)

    fwd = scores(hidden(ids_ref_fwd), hidden(ids_alt_fwd))
    rev = scores(hidden(ids_ref_rev), hidden(ids_alt_rev))
    return (fwd + rev) / 2


if __name__ == "__main__":
    key = jax.random.PRNGKey(0)
    k_emb, k_w, k_b, k1, k2, k3, k4 = jax.random.split(key, 7)

    # Deterministic synthetic "pretrained" parameters.
    embed_table = jax.random.normal(k_emb, (V, E), dtype=jnp.float32) * 0.5
    w_proj = jax.random.normal(k_w, (E, H), dtype=jnp.float32) * 0.2
    b_proj = jax.random.normal(k_b, (1, H), dtype=jnp.float32) * 0.1

    ids_ref_fwd = jax.random.randint(k1, (B, L), 0, V, dtype=jnp.int32)
    ids_alt_fwd = jax.random.randint(k2, (B, L), 0, V, dtype=jnp.int32)
    ids_ref_rev = jax.random.randint(k3, (B, L), 0, V, dtype=jnp.int32)
    ids_alt_rev = jax.random.randint(k4, (B, L), 0, V, dtype=jnp.int32)

    # Model-init-time constant fold (per-model, done once).
    blk_tbl = vep_init(embed_table, w_proj, b_proj)

    out = vep_forward(ids_ref_fwd, ids_alt_fwd, ids_ref_rev, ids_alt_rev, blk_tbl)
    out = jax.block_until_ready(out)

    ref = _reference(ids_ref_fwd, ids_alt_fwd, ids_ref_rev, ids_alt_rev,
                     embed_table, w_proj, b_proj)
    assert out.shape == (B, OUT_W), out.shape
    assert jnp.allclose(out, ref, rtol=1e-4, atol=1e-4), (out, ref)
    print("KERNEL_OK")
</pallas_src>

<mosaic_0001>
module attributes {stable_mosaic.version = 11 : i64} {
  func.func @_vep_kernel(%arg0: i32, %arg1: memref<8x32xf32, #tpu.memory_space<vmem>>, %arg2: memref<8x32xf32, #tpu.memory_space<vmem>>, %arg3: memref<32x128xf32, #tpu.memory_space<vmem>>, %arg4: memref<8x128xf32, #tpu.memory_space<vmem>>) attributes {dimension_semantics = [#tpu.dimension_semantics<arbitrary>], iteration_bounds = array<i64: 1>, scalar_prefetch = 0 : i64, scratch_operands = 0 : i64, tpu.core_type = #tpu.core_type<tc>, window_params = [{pipeline_mode = #tpu.pipeline_mode<synchronous>, transform_indices = @transform_0, window_bounds = array<i64: 8, 32>}, {pipeline_mode = #tpu.pipeline_mode<synchronous>, transform_indices = @transform_1, window_bounds = array<i64: 8, 32>}, {pipeline_mode = #tpu.pipeline_mode<synchronous>, transform_indices = @transform_2, window_bounds = array<i64: 32, 128>}, {pipeline_mode = #tpu.pipeline_mode<synchronous>, transform_indices = @transform_3, window_bounds = array<i64: 8, 128>}]} {
    %c0 = arith.constant 0 : index
    %c0_0 = arith.constant 0 : index
    %0 = vector.load %arg1[%c0, %c0_0] : memref<8x32xf32, #tpu.memory_space<vmem>>, vector<8x32xf32>
    %c0_1 = arith.constant 0 : index
    %c0_2 = arith.constant 0 : index
    %1 = vector.load %arg3[%c0_1, %c0_2] : memref<32x128xf32, #tpu.memory_space<vmem>>, vector<32x128xf32>
    %cst = arith.constant dense<0.000000e+00> : vector<8x128xf32>
    %2 = tpu.matmul %0, %1, %cst {dimension_numbers = #tpu.dot_dimension_numbers<[1], [0], [0], [1], [0, 0, 1, 1], [], []>, precision = #tpu.contract_precision<fp32>} : vector<8x32xf32>, vector<32x128xf32>, vector<8x128xf32> -> vector<8x128xf32>
    %c0_3 = arith.constant 0 : index
    %c0_4 = arith.constant 0 : index
    %3 = vector.load %arg2[%c0_3, %c0_4] : memref<8x32xf32, #tpu.memory_space<vmem>>, vector<8x32xf32>
    %c0_5 = arith.constant 0 : index
    %c0_6 = arith.constant 0 : index
    %4 = vector.load %arg3[%c0_5, %c0_6] : memref<32x128xf32, #tpu.memory_space<vmem>>, vector<32x128xf32>
    %cst_7 = arith.constant dense<0.000000e+00> : vector<8x128xf32>
    %5 = tpu.matmul %3, %4, %cst_7 {dimension_numbers = #tpu.dot_dimension_numbers<[1], [0], [0], [1], [0, 0, 1, 1], [], []>, precision = #tpu.contract_precision<fp32>} : vector<8x32xf32>, vector<32x128xf32>, vector<8x128xf32> -> vector<8x128xf32>
    %6 = arith.mulf %2, %5 : vector<8x128xf32>
    %7 = arith.subf %2, %5 : vector<8x128xf32>
    %cst_8 = arith.constant dense<0.000000e+00> : vector<128xf32>
    %8 = vector.multi_reduction <add>, %6, %cst_8 [0] : vector<8x128xf32> to vector<128xf32>
    %9 = vector.shape_cast %8 : vector<128xf32> to vector<1x128xf32>
    %10 = arith.mulf %2, %2 : vector<8x128xf32>
    %cst_9 = arith.constant dense<0.000000e+00> : vector<128xf32>
    %11 = vector.multi_reduction <add>, %10, %cst_9 [0] : vector<8x128xf32> to vector<128xf32>
    %12 = vector.shape_cast %11 : vector<128xf32> to vector<1x128xf32>
    %13 = arith.mulf %5, %5 : vector<8x128xf32>
    %cst_10 = arith.constant dense<0.000000e+00> : vector<128xf32>
    %14 = vector.multi_reduction <add>, %13, %cst_10 [0] : vector<8x128xf32> to vector<128xf32>
    %15 = vector.shape_cast %14 : vector<128xf32> to vector<1x128xf32>
    %16 = arith.mulf %7, %7 : vector<8x128xf32>
    %cst_11 = arith.constant dense<0.000000e+00> : vector<128xf32>
    %17 = vector.multi_reduction <add>, %16, %cst_11 [0] : vector<8x128xf32> to vector<128xf32>
    %18 = vector.shape_cast %17 : vector<128xf32> to vector<1x128xf32>
    %cst_12 = arith.constant dense<0.000000e+00> : vector<128xf32>
    %19 = vector.multi_reduction <add>, %7, %cst_12 [0] : vector<8x128xf32> to vector<128xf32>
    %20 = vector.shape_cast %19 : vector<128xf32> to vector<1x128xf32>
    %21 = math.sqrt %18 : vector<1x128xf32>
    %22 = arith.mulf %12, %15 : vector<1x128xf32>
    %cst_13 = arith.constant 1.000000e-16 : f32
    %23 = vector.broadcast %cst_13 : f32 to vector<1x128xf32>
    %24 = arith.maximumf %22, %23 : vector<1x128xf32>
    %25 = math.rsqrt %24 : vector<1x128xf32>
    %26 = arith.mulf %9, %25 : vector<1x128xf32>
    %cst_14 = arith.constant 1.000000e+00 : f32
    %27 = vector.broadcast %cst_14 : f32 to vector<1x128xf32>
    %28 = arith.subf %27, %26 : vector<1x128xf32>
    %29 = tpu.concatenate %9, %12, %15, %18, %20 in 0 : vector<1x128xf32>, vector<1x128xf32>, vector<1x128xf32>, vector<1x128xf32>, vector<1x128xf32> -> vector<5x128xf32>
    %30 = vector.extract_strided_slice %29 {offsets = [0, 0], sizes = [5, 32], strides = [1, 1]} : vector<5x128xf32> to vector<5x32xf32>
    %cst_15 = arith.constant dense<0.000000e+00> : vector<5xf32>
    %31 = vector.multi_reduction <add>, %30, %cst_15 [1] : vector<5x32xf32> to vector<5xf32>
    %32 = vector.shape_cast %31 : vector<5xf32> to vector<5x1xf32>
    %33 = vector.extract_strided_slice %29 {offsets = [0, 32], sizes = [5, 32], strides = [1, 1]} : vector<5x128xf32> to vector<5x32xf32>
    %cst_16 = arith.constant dense<0.000000e+00> : vector<5xf32>
    %34 = vector.multi_reduction <add>, %33, %cst_16 [1] : vector<5x32xf32> to vector<5xf32>
    %35 = vector.shape_cast %34 : vector<5xf32> to vector<5x1xf32>
    %36 = vector.extract_strided_slice %29 {offsets = [0, 64], sizes = [5, 32], strides = [1, 1]} : vector<5x128xf32> to vector<5x32xf32>
    %cst_17 = arith.constant dense<0.000000e+00> : vector<5xf32>
    %37 = vector.multi_reduction <add>, %36, %cst_17 [1] : vector<5x32xf32> to vector<5xf32>
    %38 = vector.shape_cast %37 : vector<5xf32> to vector<5x1xf32>
    %39 = vector.extract_strided_slice %29 {offsets = [0, 96], sizes = [5, 32], strides = [1, 1]} : vector<5x128xf32> to vector<5x32xf32>
    %cst_18 = arith.constant dense<0.000000e+00> : vector<5xf32>
    %40 = vector.multi_reduction <add>, %39, %cst_18 [1] : vector<5x32xf32> to vector<5xf32>
    %41 = vector.shape_cast %40 : vector<5xf32> to vector<5x1xf32>
    %42 = tpu.concatenate %32, %35, %38, %41 in 1 : vector<5x1xf32>, vector<5x1xf32>, vector<5x1xf32>, vector<5x1xf32> -> vector<5x4xf32>
    %43 = vector.extract_strided_slice %42 {offsets = [0, 0], sizes = [1, 4], strides = [1, 1]} : vector<5x4xf32> to vector<1x4xf32>
    %44 = vector.extract_strided_slice %42 {offsets = [1, 0], sizes = [1, 4], strides = [1, 1]} : vector<5x4xf32> to vector<1x4xf32>
    %45 = vector.extract_strided_slice %42 {offsets = [2, 0], sizes = [1, 4], strides = [1, 1]} : vector<5x4xf32> to vector<1x4xf32>
    %46 = vector.extract_strided_slice %42 {offsets = [3, 0], sizes = [1, 4], strides = [1, 1]} : vector<5x4xf32> to vector<1x4xf32>
    %47 = vector.extract_strided_slice %42 {offsets = [4, 0], sizes = [1, 4], strides = [1, 1]} : vector<5x4xf32> to vector<1x4xf32>
    %cst_19 = arith.constant 2.000000e-06 : f32
    %48 = vector.broadcast %cst_19 : f32 to vector<1x4xf32>
    %49 = arith.mulf %48, %47 : vector<1x4xf32>
    %50 = arith.addf %46, %49 : vector<1x4xf32>
    %cst_20 = arith.constant 2.560000e-10 : f32
    %51 = vector.broadcast %cst_20 : f32 to vector<1x4xf32>
    %52 = arith.addf %50, %51 : vector<1x4xf32>
    %53 = math.sqrt %52 : vector<1x4xf32>
    %54 = arith.mulf %44, %45 : vector<1x4xf32>
    %cst_21 = arith.constant 1.000000e-16 : f32
    %55 = vector.broadcast %cst_21 : f32 to vector<1x4xf32>
    %56 = arith.maximumf %54, %55 : vector<1x4xf32>
    %57 = math.rsqrt %56 : vector<1x4xf32>
    %58 = arith.mulf %43, %57 : vector<1x4xf32>
    %cst_22 = arith.constant 1.000000e+00 : f32
    %59 = vector.broadcast %cst_22 : f32 to vector<1x4xf32>
    %60 = arith.subf %59, %58 : vector<1x4xf32>
    %61 = vector.extract_strided_slice %21 {offsets = [0, 0], sizes = [1, 64], strides = [1, 1]} : vector<1x128xf32> to vector<1x64xf32>
    %62 = vector.extract_strided_slice %21 {offsets = [0, 64], sizes = [1, 64], strides = [1, 1]} : vector<1x128xf32> to vector<1x64xf32>
    %63 = arith.addf %61, %62 : vector<1x64xf32>
    %cst_23 = arith.constant 5.000000e-01 : f32
    %64 = vector.broadcast %cst_23 : f32 to vector<1x64xf32>
    %65 = arith.mulf %64, %63 : vector<1x64xf32>
    %66 = vector.extract_strided_slice %9 {offsets = [0, 0], sizes = [1, 64], strides = [1, 1]} : vector<1x128xf32> to vector<1x64xf32>
    %67 = vector.extract_strided_slice %9 {offsets = [0, 64], sizes = [1, 64], strides = [1, 1]} : vector<1x128xf32> to vector<1x64xf32>
    %68 = arith.addf %66, %67 : vector<1x64xf32>
    %cst_24 = arith.constant 5.000000e-01 : f32
    %69 = vector.broadcast %cst_24 : f32 to vector<1x64xf32>
    %70 = arith.mulf %69, %68 : vector<1x64xf32>
    %71 = vector.extract_strided_slice %28 {offsets = [0, 0], sizes = [1, 64], strides = [1, 1]} : vector<1x128xf32> to vector<1x64xf32>
    %72 = vector.extract_strided_slice %28 {offsets = [0, 64], sizes = [1, 64], strides = [1, 1]} : vector<1x128xf32> to vector<1x64xf32>
    %73 = arith.addf %71, %72 : vector<1x64xf32>
    %cst_25 = arith.constant 5.000000e-01 : f32
    %74 = vector.broadcast %cst_25 : f32 to vector<1x64xf32>
    %75 = arith.mulf %74, %73 : vector<1x64xf32>
    %76 = vector.extract_strided_slice %53 {offsets = [0, 0], sizes = [1, 2], strides = [1, 1]} : vector<1x4xf32> to vector<1x2xf32>
    %77 = vector.extract_strided_slice %53 {offsets = [0, 2], sizes = [1, 2], strides = [1, 1]} : vector<1x4xf32> to vector<1x2xf32>
    %78 = arith.addf %76, %77 : vector<1x2xf32>
    %cst_26 = arith.constant 5.000000e-01 : f32
    %79 = vector.broadcast %cst_26 : f32 to vector<1x2xf32>
    %80 = arith.mulf %79, %78 : vector<1x2xf32>
    %81 = vector.extract_strided_slice %43 {offsets = [0, 0], sizes = [1, 2], strides = [1, 1]} : vector<1x4xf32> to vector<1x2xf32>
    %82 = vector.extract_strided_slice %43 {offsets = [0, 2], sizes = [1, 2], strides = [1, 1]} : vector<1x4xf32> to vector<1x2xf32>
    %83 = arith.addf %81, %82 : vector<1x2xf32>
    %cst_27 = arith.constant 5.000000e-01 : f32
    %84 = vector.broadcast %cst_27 : f32 to vector<1x2xf32>
    %85 = arith.mulf %84, %83 : vector<1x2xf32>
    %86 = vector.extract_strided_slice %60 {offsets = [0, 0], sizes = [1, 2], strides = [1, 1]} : vector<1x4xf32> to vector<1x2xf32>
    %87 = vector.extract_strided_slice %60 {offsets = [0, 2], sizes = [1, 2], strides = [1, 1]} : vector<1x4xf32> to vector<1x2xf32>
    %88 = arith.addf %86, %87 : vector<1x2xf32>
    %cst_28 = arith.constant 5.000000e-01 : f32
    %89 = vector.broadcast %cst_28 : f32 to vector<1x2xf32>
    %90 = arith.mulf %89, %88 : vector<1x2xf32>
    %91 = vector.extract_strided_slice %65 {offsets = [0, 0], sizes = [1, 32], strides = [1, 1]} : vector<1x64xf32> to vector<1x32xf32>
    %92 = vector.extract_strided_slice %70 {offsets = [0, 0], sizes = [1, 32], strides = [1, 1]} : vector<1x64xf32> to vector<1x32xf32>
    %93 = vector.extract_strided_slice %75 {offsets = [0, 0], sizes = [1, 32], strides = [1, 1]} : vector<1x64xf32> to vector<1x32xf32>
    %94 = vector.extract_strided_slice %80 {offsets = [0, 0], sizes = [1, 1], strides = [1, 1]} : vector<1x2xf32> to vector<1x1xf32>
    %95 = vector.extract_strided_slice %85 {offsets = [0, 0], sizes = [1, 1], strides = [1, 1]} : vector<1x2xf32> to vector<1x1xf32>
    %96 = vector.extract_strided_slice %90 {offsets = [0, 0], sizes = [1, 1], strides = [1, 1]} : vector<1x2xf32> to vector<1x1xf32>
    %cst_29 = arith.constant 0.000000e+00 : f32
    %97 = vector.broadcast %cst_29 : f32 to vector<1x29xf32>
    %98 = tpu.concatenate %91, %92, %93, %94, %95, %96, %97 in 1 : vector<1x32xf32>, vector<1x32xf32>, vector<1x32xf32>, vector<1x1xf32>, vector<1x1xf32>, vector<1x1xf32>, vector<1x29xf32> -> vector<1x128xf32>
    %99 = vector.extract_strided_slice %65 {offsets = [0, 32], sizes = [1, 32], strides = [1, 1]} : vector<1x64xf32> to vector<1x32xf32>
    %100 = vector.extract_strided_slice %70 {offsets = [0, 32], sizes = [1, 32], strides = [1, 1]} : vector<1x64xf32> to vector<1x32xf32>
    %101 = vector.extract_strided_slice %75 {offsets = [0, 32], sizes = [1, 32], strides = [1, 1]} : vector<1x64xf32> to vector<1x32xf32>
    %102 = vector.extract_strided_slice %80 {offsets = [0, 1], sizes = [1, 1], strides = [1, 1]} : vector<1x2xf32> to vector<1x1xf32>
    %103 = vector.extract_strided_slice %85 {offsets = [0, 1], sizes = [1, 1], strides = [1, 1]} : vector<1x2xf32> to vector<1x1xf32>
    %104 = vector.extract_strided_slice %90 {offsets = [0, 1], sizes = [1, 1], strides = [1, 1]} : vector<1x2xf32> to vector<1x1xf32>
    %cst_30 = arith.constant 0.000000e+00 : f32
    %105 = vector.broadcast %cst_30 : f32 to vector<1x29xf32>
    %106 = tpu.concatenate %99, %100, %101, %102, %103, %104, %105 in 1 : vector<1x32xf32>, vector<1x32xf32>, vector<1x32xf32>, vector<1x1xf32>, vector<1x1xf32>, vector<1x1xf32>, vector<1x29xf32> -> vector<1x128xf32>
    %cst_31 = arith.constant 0.000000e+00 : f32
    %107 = vector.broadcast %cst_31 : f32 to vector<6x128xf32>
    %108 = tpu.concatenate %98, %106, %107 in 0 : vector<1x128xf32>, vector<1x128xf32>, vector<6x128xf32> -> vector<8x128xf32>
    %c0_32 = arith.constant 0 : index
    %c0_33 = arith.constant 0 : index
    %109 = vector.load %arg4[%c0_32, %c0_33] : memref<8x128xf32, #tpu.memory_space<vmem>>, vector<8x128xf32>
    tpu.vector_store %arg4[%c0_32, %c0_33], %108 {strides = array<i32>} : memref<8x128xf32, #tpu.memory_space<vmem>>, vector<8x128xf32>,
    return
  }
  func.func @transform_0(%arg0: i32) -> (i32, i32) {
    %c0_i32 = arith.constant 0 : i32
    %c0_i32_0 = arith.constant 0 : i32
    %c0_i32_1 = arith.constant 0 : i32
    return %c0_i32, %c0_i32_0 : i32, i32
  }
  func.func @transform_1(%arg0: i32) -> (i32, i32) {
    %c0_i32 = arith.constant 0 : i32
    %c0_i32_0 = arith.constant 0 : i32
    %c0_i32_1 = arith.constant 0 : i32
    return %c0_i32, %c0_i32_0 : i32, i32
  }
  func.func @transform_2(%arg0: i32) -> (i32, i32) {
    %c0_i32 = arith.constant 0 : i32
    %c0_i32_0 = arith.constant 0 : i32
    %c0_i32_1 = arith.constant 0 : i32
    return %c0_i32, %c0_i32_0 : i32, i32
  }
  func.func @transform_3(%arg0: i32) -> (i32, i32) {
    %c0_i32 = arith.constant 0 : i32
    %c0_i32_0 = arith.constant 0 : i32
    %c0_i32_1 = arith.constant 0 : i32
    return %c0_i32, %c0_i32_0 : i32, i32
  }
}

</mosaic_0001>

<bundles_post_ra>
// kernel: vep_forward.1
= control target key start
LH: loop header
LB: loop body
LE: loop exit
PB: predicated region body
PF: predicated region fallthrough
CT: control target
= control target key end

     0   :  { %vm19_vm0 = vcmask 261120   ;;  %v1413_v0 = vmov 0.0   ;;  %vm1414_vm1 = vmmov 0   ;;  %vm1044_vm2 = vcmask 1040384   ;;  %s1416_s22 = smov 96   ;;  %s1417_s23 = smov 64   ;;  %s1674_s2 = inlined_call_operand.vmem [shape: f32[32,128], index: 2, kind: input, shape index: {}]   ;;  %s1675_s0 = inlined_call_operand.vmem [shape: f32[8,32], index: 0, kind: input, shape index: {}]   ;;  %s1676_s1 = inlined_call_operand.vmem [shape: f32[8,32], index: 1, kind: input, shape index: {}]   ;;  %s1677_s3 = inlined_call_operand.vmem [shape: f32[8,128], index: 3, kind: output, shape index: {}]  }
   0x1   :  { %1264 = vmatprep.subr.mxu0 %v1413_v0  ;;  %v18_v1 = vld [vmem:[%s1674_s2 + $0x18] sm:$0xff]  ;;  %v17_v2 = vld [vmem:[%s1674_s2 + $0x10] sm:$0xff]  ;;  %v16_v3 = vld [vmem:[%s1674_s2 + $0x8] sm:$0xff]  ;;  %1275 = vmatprep.subr.mxu1 %v1413_v0  ;;  %vm1046_vm3 = vcmask 1041408   ;;  %vm1048_vm4 = vcmask 1042432   ;;  %vm1050_vm5 = vcmask 1043456  }
   0x2   :  { %v1453_v4 = vand.u32 4294901760, %v18_v1  ;;  %v1455_v5 = vand.u32 4294901760, %v17_v2  ;;  %v1457_v6 = vand.u32 4294901760, %v16_v3  ;;  %v15_v7 = vld [vmem:[%s1674_s2] sm:$0xff]  ;;  %1272 = vmatprep.mubr.msk.f32.mxu0 %vm1414_vm1, %v1413_v0  ;;  %1283 = vmatprep.mubr.msk.f32.mxu1 %vm1414_vm1, %v1413_v0  ;;  %vm1052_vm6 = vcmask 258048   ;;  %s1418_s24 = smov 126  }
   0x3   :  { %v14_v8 = vld [vmem:[%s1675_s0] sm:$0xff]  ;;  %v1469_v9 = vand.u32 4294901760, %v15_v7  ;;  %vm1075_vm9 = vcmask 7168   ;;  %vm1077_vm10 = vcmask 15360   ;;  %vm1079_vm11 = vcmask 23552   ;;  %s1419_s25 = smov 97  }
   0x4   :  { %v21_v10 = vsel %vm19_vm0, %v14_v8, 0  ;;  %1265 = vmatpush3.msra.mxu0 %v1453_v4  ;;  %v1474_v11 = vsub.f32 %v18_v1, %v1453_v4  ;;  %v1479_v13 = vsub.f32 %v17_v2, %v1455_v5  ;;  %v1482_v14 = vsub.f32 %v16_v3, %v1457_v6  ;;  %v508_v32 = vld [vmem:[%s1676_s1] sm:$0xff]  ;;  %s1415_s1 = smov 32   ;;  %s1420_s26 = smov 95  }
   0x5   :  { %v1476_v12 = vand.u32 4294901760, %v21_v10  ;;  %1266 = vmatprep.subr.mxu0 %v1413_v0  ;;  %v1486_v15 = vsub.f32 %v15_v7, %v1469_v9  ;;  %v510_v33 = vsel %vm19_vm0, %v508_v32, 0  ;;  %s1421_s27 = smov 98   ;;  %vm1162_vm14 = vcmask 523264  }
   0x6   :  { %1267 = vmatpush3.msra.mxu0 %v1455_v5  ;;  %v1490_v16 = vand.u32 4294901760, %v1474_v11  ;;  %v1494_v18 = vand.u32 4294901760, %v1479_v13  ;;  %v1497_v19 = vand.u32 4294901760, %v1482_v14  ;;  %v1548_v34 = vand.u32 4294901760, %v510_v33 }
   0x7   :  { %v93_v17 = vsub.f32 %v21_v10, %v1476_v12  ;;  %1268 = vmatprep.subr.mxu0 %v1413_v0  ;;  %v1501_v20 = vand.u32 4294901760, %v1486_v15  ;;  %vm1164_vm15 = vcmask 785408  }
   0x8   :  { %1269 = vmatpush3.msra.mxu0 %v1457_v6  ;;  %v130_v21 = vsub.f32 %v1474_v11, %v1490_v16  ;;  %v137_v23 = vsub.f32 %v1479_v13, %v1494_v18  ;;  %v144_v24 = vsub.f32 %v1482_v14, %v1497_v19  ;;  %v1559_v35 = vsub.f32 %v510_v33, %v1548_v34 }
   0x9   :  { %v94_v22 = vand.u32 4294901760, %v93_v17  ;;  %1270 = vmatprep.subr.mxu0 %v1413_v0  ;;  %v151_v28 = vsub.f32 %v1486_v15, %v1501_v20 }
   0xa   :  { %1271 = vmatpush3.msra.mxu0 %v1469_v9  ;;  %v1512_v25 = vand.u32 4294901760, %v130_v21  ;;  %v1514_v27 = vand.u32 4294901760, %v137_v23  ;;  %v1520_v30 = vand.u32 4294901760, %v144_v24  ;;  %v583_v36 = vand.u32 4294901760, %v1559_v35 }
   0xb   :  { %v95_v26 = vsub.f32 %v93_v17, %v94_v22  ;;  %1286 = vmatprep.subr.mxu0 %v1413_v0  ;;  %v1524_v31 = vand.u32 4294901760, %v151_v28 }
   0xc   :  { %1276 = vmatpush3.msra.mxu1 %v1512_v25  ;;  %v584_v37 = vsub.f32 %v1559_v35, %v583_v36 }
   0xd   :  { %v96_v29 = vand.u32 4294901760, %v95_v26  ;;  %1277 = vmatprep.subr.mxu1 %v1413_v0 }
   0xe   :  { %1278 = vmatpush3.msra.mxu1 %v1514_v27  ;;  %v585_v38 = vand.u32 4294901760, %v584_v37 }
   0xf   :  { %1273 = vmatmul.mubr.f32.vlgmr.msra.gmra.mxu0 %v96_v29  ;;  %1279 = vmatprep.subr.mxu1 %v1413_v0 }
  0x10   :  { %1287 = vmatpush3.msra.mxu0 %v1474_v11  ;;  %1280 = vmatpush3.msra.mxu1 %v1520_v30 }
  0x11   :  { %1288 = vmatprep.subr.mxu0 %v1413_v0  ;;  %1281 = vmatprep.subr.mxu1 %v1413_v0 }
  0x12   :  { %1289 = vmatpush3.msra.mxu0 %v1479_v13  ;;  %1282 = vmatpush3.msra.mxu1 %v1524_v31 }
  0x13   :  { %1290 = vmatprep.subr.mxu0 %v1413_v0  ;;  %1284 = vmatmul.mubr.f32.vlgmr.msra.gmra.mxu1 %v1476_v12 }
  0x14   :  { %1291 = vmatpush3.msra.mxu0 %v1482_v14  ;;  %1297 = vmatprep.subr.mxu1 %v1413_v0 }
  0x15   :  { %1292 = vmatprep.subr.mxu0 %v1413_v0  ;;  %1294 = vmatprep.mubr.msk.f32.mxu0 %vm1414_vm1, %v1413_v0 }
  0x16   :  { %1293 = vmatpush3.msra.mxu0 %v1486_v15  ;;  %1298 = vmatpush3.msra.mxu1 %v1453_v4 }
  0x17   :  { %1295 = vmatmul.mubr.f32.vlgmr.msra.gmra.mxu0 %v93_v17  ;;  %1299 = vmatprep.subr.mxu1 %v1413_v0 }
  0x18   :  { %1308 = vmatprep.subr.mxu0 %v1413_v0  ;;  %1300 = vmatpush3.msra.mxu1 %v1455_v5 }
  0x19   :  { %1309 = vmatpush3.msra.mxu0 %v1490_v16  ;;  %1301 = vmatprep.subr.mxu1 %v1413_v0 }
  0x1a   :  { %1310 = vmatprep.subr.mxu0 %v1413_v0  ;;  %1302 = vmatpush3.msra.mxu1 %v1457_v6 }
  0x1b   :  { %1311 = vmatpush3.msra.mxu0 %v1494_v18  ;;  %1303 = vmatprep.subr.mxu1 %v1413_v0 }
  0x1c   :  { %1312 = vmatprep.subr.mxu0 %v1413_v0  ;;  %1304 = vmatpush3.msra.mxu1 %v1469_v9 }
  0x1d   :  { %1305 = vmatprep.mubr.msk.f32.mxu1 %vm1414_vm1, %v1413_v0  ;;  %1313 = vmatpush3.msra.mxu0 %v1497_v19 }
  0x1e   :  { %1306 = vmatmul.mubr.f32.vlgmr.msra.gmra.mxu1 %v94_v22  ;;  %1314 = vmatprep.subr.mxu0 %v1413_v0 }
  0x1f   :  { %1319 = vmatprep.subr.mxu1 %v1413_v0  ;;  %1315 = vmatpush3.msra.mxu0 %v1501_v20 }
  0x20   :  { %1316 = vmatprep.mubr.msk.f32.mxu0 %vm1414_vm1, %v1413_v0  ;;  %1320 = vmatpush3.msra.mxu1 %v1453_v4 }
  0x21   :  { %1317 = vmatmul.mubr.f32.vlgmr.msra.gmra.mxu0 %v1476_v12  ;;  %1321 = vmatprep.subr.mxu1 %v1413_v0 }
  0x22   :  { %1330 = vmatprep.subr.mxu0 %v1413_v0  ;;  %1322 = vmatpush3.msra.mxu1 %v1455_v5 }
  0x23   :  { %1331 = vmatpush3.msra.mxu0 %v1453_v4  ;;  %1323 = vmatprep.subr.mxu1 %v1413_v0 }
  0x24   :  { %1332 = vmatprep.subr.mxu0 %v1413_v0  ;;  %1324 = vmatpush3.msra.mxu1 %v1457_v6 }
  0x25   :  { %1333 = vmatpush3.msra.mxu0 %v1455_v5  ;;  %1325 = vmatprep.subr.mxu1 %v1413_v0 }
  0x26   :  { %1334 = vmatprep.subr.mxu0 %v1413_v0  ;;  %1326 = vmatpush3.msra.mxu1 %v1469_v9 }
  0x27   :  { %1327 = vmatprep.mubr.msk.f32.mxu1 %vm1414_vm1, %v1413_v0  ;;  %1335 = vmatpush3.msra.mxu0 %v1457_v6 }
  0x28   :  { %1328 = vmatmul.mubr.f32.vlgmr.msra.gmra.mxu1 %v1476_v12  ;;  %1336 = vmatprep.subr.mxu0 %v1413_v0 }
  0x29   :  { %1341 = vmatprep.subr.mxu1 %v1413_v0  ;;  %1337 = vmatpush3.msra.mxu0 %v1469_v9 }
  0x2a   :  { %1342 = vmatpush3.msra.mxu1 %v1512_v25  ;;  %1338 = vmatprep.mubr.msk.f32.mxu0 %vm1414_vm1, %v1413_v0 }
  0x2b   :  { %1343 = vmatprep.subr.mxu1 %v1413_v0  ;;  %1352 = vmatprep.subr.mxu0 %v1413_v0 }
  0x2c   :  { %1339 = vmatmul.mubr.f32.vlgmr.msra.gmra.mxu0 %v585_v38  ;;  %1344 = vmatpush3.msra.mxu1 %v1514_v27 }
  0x2d   :  { %1353 = vmatpush3.msra.mxu0 %v1474_v11  ;;  %1345 = vmatprep.subr.mxu1 %v1413_v0 }
  0x2e   :  { %1354 = vmatprep.subr.mxu0 %v1413_v0  ;;  %1346 = vmatpush3.msra.mxu1 %v1520_v30 }
  0x2f   :  { %1355 = vmatpush3.msra.mxu0 %v1479_v13  ;;  %1347 = vmatprep.subr.mxu1 %v1413_v0 }
  0x30   :  { %1356 = vmatprep.subr.mxu0 %v1413_v0  ;;  %1348 = vmatpush3.msra.mxu1 %v1524_v31 }
  0x31   :  { %1349 = vmatprep.mubr.msk.f32.mxu1 %vm1414_vm1, %v1413_v0  ;;  %1357 = vmatpush3.msra.mxu0 %v1482_v14 }
  0x32   :  { %1350 = vmatmul.mubr.f32.vlgmr.msra.gmra.mxu1 %v1548_v34  ;;  %1358 = vmatprep.subr.mxu0 %v1413_v0 }
  0x33   :  { %1363 = vmatprep.subr.mxu1 %v1413_v0  ;;  %1359 = vmatpush3.msra.mxu0 %v1486_v15 }
  0x34   :  { %1360 = vmatprep.mubr.msk.f32.mxu0 %vm1414_vm1, %v1413_v0  ;;  %1364 = vmatpush3.msra.mxu1 %v1453_v4 }
  0x35   :  { %1361 = vmatmul.mubr.f32.vlgmr.msra.gmra.mxu0 %v1559_v35  ;;  %1365 = vmatprep.subr.mxu1 %v1413_v0 }
  0x36   :  { %1374 = vmatprep.subr.mxu0 %v1413_v0  ;;  %1366 = vmatpush3.msra.mxu1 %v1455_v5 }
  0x37   :  { %1375 = vmatpush3.msra.mxu0 %v1490_v16  ;;  %1367 = vmatprep.subr.mxu1 %v1413_v0 }
  0x38   :  { %1376 = vmatprep.subr.mxu0 %v1413_v0  ;;  %1368 = vmatpush3.msra.mxu1 %v1457_v6 }
  0x39   :  { %1377 = vmatpush3.msra.mxu0 %v1494_v18  ;;  %1369 = vmatprep.subr.mxu1 %v1413_v0 }
  0x3a   :  { %1378 = vmatprep.subr.mxu0 %v1413_v0  ;;  %1370 = vmatpush3.msra.mxu1 %v1469_v9 }
  0x3b   :  { %1371 = vmatprep.mubr.msk.f32.mxu1 %vm1414_vm1, %v1413_v0  ;;  %1379 = vmatpush3.msra.mxu0 %v1497_v19 }
  0x3c   :  { %1372 = vmatmul.mubr.f32.vlgmr.msra.gmra.mxu1 %v583_v36  ;;  %1380 = vmatprep.subr.mxu0 %v1413_v0 }
  0x3d   :  { %1385 = vmatprep.subr.mxu1 %v1413_v0  ;;  %1381 = vmatpush3.msra.mxu0 %v1501_v20 }
  0x3e   :  { %1382 = vmatprep.mubr.msk.f32.mxu0 %vm1414_vm1, %v1413_v0  ;;  %1386 = vmatpush3.msra.mxu1 %v1453_v4 }
  0x3f   :  { %1383 = vmatmul.mubr.f32.vlgmr.msra.gmra.mxu0 %v1548_v34  ;;  %1387 = vmatprep.subr.mxu1 %v1413_v0 }
  0x40   :  { %1393 = vmatprep.mubr.msk.f32.mxu1 %vm1414_vm1, %v1413_v0  ;;  %1388 = vmatpush3.msra.mxu1 %v1455_v5  ;;  %vm1166_vm1 = vcmask 793600  }
  0x41   :  { %1389 = vmatprep.subr.mxu1 %v1413_v0 }
  0x42   :  { %1390 = vmatpush3.msra.mxu1 %v1457_v6 }
  0x43   :  { %1391 = vmatprep.subr.mxu1 %v1413_v0 }
  0x44   :  { %1392 = vmatpush3.msra.mxu1 %v1469_v9 }
  0x45   :  { %1394 = vmatmul.mubr.f32.vlgmr.msra.gmra.mxu1 %v1548_v34 }
  0xcf   :  { %v98_v39 = vpop.f32.mrf.mxu0 }
  0xd1   :  { %v1274_v40 = vpop.f32.mrf.mxu0 }
  0xd3   :  { %v189_v41 = vpop.f32.mrf.mxu1 }
  0xd4   :  { %v190_v51 = vadd.f32 %v189_v41, %v98_v39 }
  0xd5   :  { %v1285_v42 = vpop.f32.mrf.mxu1 }
  0xd7   :  { %v269_v43 = vpop.f32.mrf.mxu0 }
  0xd8   :  { %v270_v54 = vadd.f32 %v269_v43, %v190_v51 }
  0xd9   :  { %v1296_v44 = vpop.f32.mrf.mxu0 }
  0xde   :  { %v346_v45 = vpop.f32.mrf.mxu1 }
  0xdf   :  { %v347_v55 = vadd.f32 %v346_v45, %v270_v54 }
  0xe0   :  { %v1307_v46 = vpop.f32.mrf.mxu1 }
  0xe1   :  { %v429_v47 = vpop.f32.mrf.mxu0 }
  0xe2   :  { %v430_v59 = vadd.f32 %v429_v47, %v347_v55 }
  0xe3   :  { %v1318_v48 = vpop.f32.mrf.mxu0 }
  0xe8   :  { %v504_v49 = vpop.f32.mrf.mxu1 }
  0xe9   :  { %v505_v61 = vadd.f32 %v504_v49, %v430_v59 }
  0xea   :  { %v1329_v50 = vpop.f32.mrf.mxu1 }
  0xeb   :  { %v1005_v63 = vmul.f32 %v505_v61, %v505_v61 }
  0xec   :  { %v587_v52 = vpop.f32.mrf.mxu0 }
  0xed   :  { %v1006_v4 = vrot.slane %v1005_v63, 4 }
  0xee   :  { %v1340_v53 = vpop.f32.mrf.mxu0 }
  0xef   :  { %v1007_v7 = vadd.f32 %v1006_v4, %v1005_v63 }
  0xf1   :  { %v1008_v11 = vrot.slane %v1007_v7, 2 }
  0xf2   :  { %v678_v56 = vpop.f32.mrf.mxu1 }
  0xf3   :  { %v679_v62 = vadd.f32 %v678_v56, %v587_v52  ;;  %v1009_v20 = vadd.f32 %v1008_v11, %v1007_v7 }
  0xf4   :  { %v1351_v57 = vpop.f32.mrf.mxu1 }
  0xf5   :  { %v758_v58 = vpop.f32.mrf.mxu0  ;;  %v1010_v29 = vrot.slane %v1009_v20, 1 }
  0xf6   :  { %v759_v2 = vadd.f32 %v758_v58, %v679_v62 }
  0xf7   :  { %v1362_v60 = vpop.f32.mrf.mxu0  ;;  %v1011_v38 = vadd.f32 %v1010_v29, %v1009_v20 }
  0xfc   :  { %v835_v0 = vpop.f32.mrf.mxu1 }
  0xfd   :  { %v836_v5 = vadd.f32 %v835_v0, %v759_v2 }
  0xfe   :  { %v1373_v1 = vpop.f32.mrf.mxu1 }
  0xff   :  { %v918_v3 = vpop.f32.mrf.mxu0 }
 0x100   :  { %v919_v8 = vadd.f32 %v918_v3, %v836_v5 }
 0x101   :  { %v1384_v6 = vpop.f32.mrf.mxu0 }
 0x105   :  { %v993_v9 = vpop.f32.mrf.mxu1 }
 0x106   :  { %v994_v10 = vadd.f32 %v993_v9, %v919_v8 }
 0x107   :  { %v1395_v12 = vpop.f32.mrf.mxu1 }
 0x108   :  { %v997_v13 = vmul.f32 %v994_v10, %v505_v61  ;;  %v998_v14 = vsub.f32 %v505_v61, %v994_v10  ;;  %v1012_v15 = vmul.f32 %v994_v10, %v994_v10 }
 0x10a   :  { %v999_v16 = vrot.slane %v997_v13, 4  ;;  %v1013_v17 = vrot.slane %v1012_v15, 4  ;;  %v1019_v18 = vmul.f32 %v998_v14, %v998_v14  ;;  %v1026_v19 = vrot.slane %v998_v14, 4 }
 0x10c   :  { %v1000_v21 = vadd.f32 %v999_v16, %v997_v13  ;;  %v1014_v22 = vadd.f32 %v1013_v17, %v1012_v15  ;;  %v1020_v23 = vrot.slane %v1019_v18, 4  ;;  %v1027_v24 = vadd.f32 %v1026_v19, %v998_v14 }
 0x10e   :  { %v1001_v25 = vrot.slane %v1000_v21, 2  ;;  %v1015_v26 = vrot.slane %v1014_v22, 2  ;;  %v1021_v27 = vadd.f32 %v1020_v23, %v1019_v18  ;;  %v1028_v28 = vrot.slane %v1027_v24, 2 }
 0x110   :  { %v1002_v30 = vadd.f32 %v1001_v25, %v1000_v21  ;;  %v1016_v31 = vadd.f32 %v1015_v26, %v1014_v22  ;;  %v1022_v32 = vrot.slane %v1021_v27, 2  ;;  %v1029_v33 = vadd.f32 %v1028_v28, %v1027_v24 }
 0x112   :  { %v1003_v34 = vrot.slane %v1002_v30, 1  ;;  %v1017_v35 = vrot.slane %v1016_v31, 1  ;;  %v1023_v36 = vadd.f32 %v1022_v32, %v1021_v27  ;;  %v1030_v37 = vrot.slane %v1029_v33, 1 }
 0x114   :  { %v1647_v39 = vadd.f32 %v1003_v34, %v1002_v30  ;;  %v1018_v40 = vadd.f32 %v1017_v35, %v1016_v31  ;;  %v1024_v41 = vrot.slane %v1023_v36, 1  ;;  %v1031_v45 = vadd.f32 %v1030_v37, %v1029_v33 }
 0x116   :  { %v1025_v42 = vadd.f32 %v1024_v41, %v1023_v36  ;;  %v1039_v43 = vmul.f32 %v1018_v40, %v1011_v38  ;;  %v1045_v44 = vsel %vm1044_vm2, %v1647_v39, %v1011_v38 }
 0x117   :  { %v1047_v46 = vsel %vm1046_vm3, %v1045_v44, %v1018_v40 }
 0x118   :  { %v1049_v47 = vsel %vm1048_vm4, %v1047_v46, %v1025_v42  ;;  %v1040_v50 = vmax.f32 %v1039_v43, 1e-16  ;;  %vm1034_vm7 = vcmp.eq.f32.partialorder %v1025_v42, inf  ;;  %v1037_v63 = vand.u32 2147483648, %v1025_v42 }
 0x119   :  { %v1051_v48 = vsel %vm1050_vm5, %v1049_v47, %v1031_v45  ;;  %vm1036_vm8 = vcmp.eq.f32.partialorder %v1025_v42, 0.0  ;;  %vm1168_vm4 = vcmask 801792   ;;  %vm1170_vm5 = vcmask 809984  }
 0x11a   :  { %1069 = vrot.lane.b32.xlu1 %v1051_v48, %s1415_s1  ;;  %1057 = vrot.lane.b32.xlu0 %v1051_v48, %s1416_s22  ;;  %v1053_v49 = vsel %vm1052_vm6, %v1051_v48, 0.0  ;;  %1405 = vrsqrt.f32 %v1040_v50 }
 0x11b   :  { %1407 = vrsqrt.f32 %v1025_v42 }
 0x11e   :  { %1063 = vrot.lane.b32.xlu0 %v1051_v48, %s1417_s23 }
 0x127   :  { %v1406_v57 = vpop.eup %1405 }
 0x128   :  { %v1042_v58 = vmul.f32 %v1406_v57, %v1647_v39  ;;  %v1408_v59 = vpop.eup %1407 }
 0x129   :  { %v1033_v61 = vmul.f32 %v1408_v59, %v1025_v42 }
 0x12a   :  { %v1043_v60 = vsub.f32 1.0, %v1042_v58 }
 0x12b   :  { %v1035_v62 = vsel %vm1034_vm7, %v1025_v42, %v1033_v61 }
 0x12c   :  { %v1038_v0 = vsel %vm1036_vm8, %v1037_v63, %v1035_v62 }
 0x13e   :  { %1054 = vadd.xlane.f32.xlu1 %v1053_v49 }
 0x18c   :  { %v1070_v51 = vpop.permute.xlu1 %1069  ;;  %v1058_v52 = vpop.permute.xlu0 %1057 }
 0x18d   :  { %v1060_v53 = vsel %vm1052_vm6, %v1058_v52, 0.0  ;;  %v1072_v54 = vsel %vm1052_vm6, %v1070_v51, 0.0 }
 0x18e   :  { %1061 = vadd.xlane.f32.xlu0 %v1060_v53  ;;  %1073 = vadd.xlane.f32.xlu1 %v1072_v54 }
 0x190   :  { %v1064_v55 = vpop.permute.xlu0 %1063 }
 0x191   :  { %v1066_v56 = vsel %vm1052_vm6, %v1064_v55, 0.0 }
 0x192   :  { %1067 = vadd.xlane.f32.xlu0 %v1066_v56 }
 0x19f   :  { %1118 = vrot.lane.b32.xlu1 %v1043_v60, %s1417_s23 }
 0x1a8   :  { %1106 = vrot.lane.b32.xlu0 %v1038_v0, %s1417_s23 }
 0x1ac   :  { %1112 = vrot.lane.b32.xlu0 %v1647_v39, %s1417_s23 }
 0x1c7   :  { %v1055_v2 = vpop.xlane.xlu1 %1054 }
 0x217   :  { %v1062_v1 = vpop.xlane.xlu0 %1061  ;;  %v1074_v5 = vpop.xlane.xlu1 %1073 }
 0x218   :  { %v1076_v3 = vsel %vm1075_vm9, %v1055_v2, %v1062_v1 }
 0x21b   :  { %v1068_v4 = vpop.xlane.xlu0 %1067  ;;  %v1119_v19 = vpop.permute.xlu1 %1118 }
 0x21c   :  { %v1078_v6 = vsel %vm1077_vm10, %v1076_v3, %v1068_v4  ;;  %v1121_v23 = vadd.f32 %v1119_v19, %v1043_v60 }
 0x21d   :  { %v1080_v7 = vsel %vm1079_vm11, %v1078_v6, %v1074_v5 }
 0x21e   :  { %v1081_v8 = vmul.f32 2e-06, %v1080_v7  ;;  %v1095_v9 = vrot.slane %v1080_v7, 1  ;;  %v1122_v28 = vmul.f32 0.5, %v1121_v23 }
 0x21f   :  { %v1107_v16 = vpop.permute.xlu0 %1106 }
 0x220   :  { %v1083_v10 = vrot.slane %v1081_v8, 1  ;;  %v1097_v11 = vmul.f32 %v1095_v9, %v1080_v7  ;;  %v1109_v30 = vadd.f32 %v1107_v16, %v1038_v0 }
 0x222   :  { %v1085_v12 = vadd.f32 %v1083_v10, %v1080_v7  ;;  %v1098_v13 = vmax.f32 %v1097_v11, 1e-16  ;;  %v1110_v32 = vmul.f32 0.5, %v1109_v30 }
 0x223   :  { %v1113_v26 = vpop.permute.xlu0 %1112 }
 0x224   :  { %v1086_v14 = vadd.f32 2.56e-10, %v1085_v12  ;;  %1409 = vrsqrt.f32 %v1098_v13  ;;  %v1115_v29 = vadd.f32 %v1113_v26, %v1647_v39 }
 0x226   :  { %1411 = vrsqrt.f32 %v1086_v14  ;;  %vm1089_vm12 = vcmp.eq.f32.partialorder %v1086_v14, inf  ;;  %v1092_v22 = vand.u32 2147483648, %v1086_v14  ;;  %vm1091_vm13 = vcmp.eq.f32.partialorder %v1086_v14, 0.0 }
 0x227   :  { %v1116_v31 = vmul.f32 0.5, %v1115_v29 }
 0x231   :  { %v1410_v15 = vpop.eup %1409 }
 0x232   :  { %v1101_v17 = vrot.slane %v1410_v15, 1 }
 0x233   :  { %v1412_v18 = vpop.eup %1411 }
 0x234   :  { %v1103_v20 = vmul.f32 %v1101_v17, %v1080_v7  ;;  %v1088_v21 = vmul.f32 %v1412_v18, %v1086_v14 }
 0x236   :  { %v1104_v24 = vsub.f32 1.0, %v1103_v20  ;;  %v1090_v25 = vsel %vm1089_vm12, %v1086_v14, %v1088_v21 }
 0x237   :  { %v1093_v27 = vsel %vm1091_vm13, %v1092_v22, %v1090_v25 }
 0x238   :  { %1135 = vrot.lane.b32.xlu0 %v1104_v24, %s1418_s24  ;;  %1124 = vrot.lane.b32.xlu1 %v1093_v27, %s1418_s24 }
 0x23c   :  { %1129 = vrot.lane.b32.xlu1 %v1080_v7, %s1418_s24  ;;  %1145 = vrot.lane.b32.xlu0 %v1122_v28, %s1417_s23 }
 0x240   :  { %1141 = vrot.lane.b32.xlu1 %v1116_v31, %s1415_s1  ;;  %1176 = vrot.lane.b32.xlu0 %v1122_v28, %s1415_s1 }
 0x244   :  { %1173 = vrot.lane.b32.xlu1 %v1110_v32, %s1416_s22 }
 0x2aa   :  { %v1125_v33 = vpop.permute.xlu1 %1124  ;;  %v1136_v40 = vpop.permute.xlu0 %1135 }
 0x2ab   :  { %v1127_v34 = vadd.f32 %v1125_v33, %v1093_v27  ;;  %v1138_v41 = vadd.f32 %v1136_v40, %v1104_v24 }
 0x2ad   :  { %v1128_v35 = vmul.f32 0.5, %v1127_v34  ;;  %v1139_v42 = vmul.f32 0.5, %v1138_v41 }
 0x2ae   :  { %v1130_v36 = vpop.permute.xlu1 %1129  ;;  %v1146_v44 = vpop.permute.xlu0 %1145 }
 0x2af   :  { %v1149_v37 = vrot.slane %v1128_v35, 3  ;;  %v1132_v38 = vadd.f32 %v1130_v36, %v1080_v7 }
 0x2b1   :  { %v1133_v39 = vmul.f32 0.5, %v1132_v38  ;;  %1150 = vrot.lane.b32.xlu1 %v1149_v37, %s1416_s22 }
 0x2b2   :  { %v1142_v43 = vpop.permute.xlu1 %1141  ;;  %v1177_v46 = vpop.permute.xlu0 %1176 }
 0x2b3   :  { %1154 = vrot.lane.b32.xlu0 %v1133_v39, %s1419_s25  ;;  %v1161_v50 = vsel %vm19_vm0, %v1110_v32, %v1142_v43 }
 0x2b4   :  { %v1163_v54 = vsel %vm1162_vm14, %v1161_v50, %v1146_v44 }
 0x2b5   :  { %1179 = vrot.lane.b32.xlu1 %v1149_v37, %s1420_s26 }
 0x2b6   :  { %v1174_v45 = vpop.permute.xlu1 %1173 }
 0x2b7   :  { %1182 = vrot.lane.b32.xlu0 %v1133_v39, %s1416_s22  ;;  %v1188_v48 = vsel %vm19_vm0, %v1174_v45, %v1116_v31 }
 0x2b8   :  { %v1189_v51 = vsel %vm1162_vm14, %v1188_v48, %v1177_v46 }
 0x2b9   :  { %1185 = vrot.lane.b32.xlu1 %v1139_v42, %s1419_s25 }
 0x2bb   :  { %1158 = vrot.lane.b32.xlu0 %v1139_v42, %s1421_s27 }
 0x323   :  { %v1151_v47 = vpop.permute.xlu1 %1150 }
 0x324   :  { %v1165_v56 = vsel %vm1164_vm15, %v1163_v54, %v1151_v47 }
 0x325   :  { %v1155_v49 = vpop.permute.xlu0 %1154 }
 0x326   :  { %v1167_v60 = vsel %vm1166_vm1, %v1165_v56, %v1155_v49 }
 0x327   :  { %v1180_v52 = vpop.permute.xlu1 %1179 }
 0x328   :  { %v1190_v53 = vsel %vm1164_vm15, %v1189_v51, %v1180_v52 }
 0x329   :  { %v1183_v55 = vpop.permute.xlu0 %1182 }
 0x32a   :  { %v1191_v57 = vsel %vm1166_vm1, %v1190_v53, %v1183_v55 }
 0x32b   :  { %v1186_v58 = vpop.permute.xlu1 %1185 }
 0x32c   :  { %v1192_v59 = vsel %vm1168_vm4, %v1191_v57, %v1186_v58 }
 0x32d   :  { %v1193_v61 = vsel %vm1170_vm5, %v1192_v59, 0.0  ;;  %v1159_v62 = vpop.permute.xlu0 %1158 }
 0x32e   :  { %v1195_v63 = vrot.slane %v1193_v61, 7  ;;  %v1169_v0 = vsel %vm1168_vm4, %v1167_v60, %v1159_v62 }
 0x32f   :  { %v1171_v1 = vsel %vm1170_vm5, %v1169_v0, 0.0 }
 0x330   :  { %v1197_v2 = vsel %vm1044_vm2, %v1171_v1, %v1195_v63 }
 0x331   :  { %v1198_v3 = vsel %vm1046_vm3, %v1197_v2, 0.0 }
 0x332   :  { %1199 = vst [vmem:[%s1677_s3] sm:$0xff] %v1198_v3 }

</bundles_post_ra>
